<compile_context>
chip_gen: v7x
topology: tpu7x:2x2x1
jax: 0.10.0
libtpu: 0.0.40
codegen_flags: <defaults>
</compile_context>

<pallas_src>
import functools

import jax
import jax.numpy as jnp
from jax import lax
from jax.experimental import pallas as pl
from jax.experimental.pallas import tpu as pltpu


# --------------------------------------------------------------------------
# Pallas kernels
# --------------------------------------------------------------------------

def _pw_conv_bn_relu_kernel(x_ref, w_ref, scale_ref, shift_ref, o_ref):
    """Fused 1x1x1 conv(s) + folded BN + ReLU as a single row-tiled matmul.

    x: (TILE_M, Cin)  w: (Cin, Cout)  scale/shift: (1, Cout)  o: (TILE_M, Cout)
    """
    y = jnp.dot(x_ref[...], w_ref[...], preferred_element_type=jnp.float32)
    y = y * scale_ref[...] + shift_ref[...]
    o_ref[...] = jnp.maximum(y, 0.0).astype(o_ref.dtype)


def _conv3x3x3_bn_relu_kernel(xm_ref, xc_ref, xp_ref, w_ref, scale_ref,
                              shift_ref, o_ref, acc_ref, *, H, W):
    """3x3x3 'SAME' conv + folded BN + ReLU for one (batch, t) output slice.

    xm/xc/xp: (1, 1, H+2, W+2, Cin)  -- time slices t-1, t, t+1 (H/W padded).
    w:        (3, 9*Cin, Cout)       -- per-kd weight, rows ordered (kh,kw,ci).
    scale/shift: (1, Cout)           o: (1, H*W, Cout)
    acc_ref:  VMEM scratch (H*W, Cout) f32 accumulator.
    """
    t = pl.program_id(1)
    nt = pl.num_programs(1)
    prev_valid = (t > 0).astype(jnp.float32)
    next_valid = (t < nt - 1).astype(jnp.float32)

    slabs = ((xm_ref, prev_valid), (xc_ref, None), (xp_ref, next_valid))
    for kd in range(3):
        ref, msk = slabs[kd]
        xs = ref[...][0, 0]                      # (H+2, W+2, Cin)
        if msk is not None:
            xs = xs * msk                        # temporal zero padding
        cin = xs.shape[-1]
        taps = []
        for kh in range(3):
            for kw in range(3):
                taps.append(xs[kh:kh + H, kw:kw + W, :].reshape(H * W, cin))
        patch = jnp.concatenate(taps, axis=-1)   # (H*W, 9*Cin)  deep-K operand
        contrib = jnp.dot(patch, w_ref[kd], preferred_element_type=jnp.float32)
        if kd == 0:
            acc_ref[...] = contrib
        else:
            acc_ref[...] += contrib

    y = acc_ref[...] * scale_ref[...] + shift_ref[...]
    o_ref[0] = jnp.maximum(y, 0.0).astype(o_ref.dtype)


def _maxpool_unit1x1_kernel(xm_ref, xc_ref, xp_ref, w_ref, scale_ref,
                            shift_ref, o_ref, *, H, W):
    """TF-SAME 3x3x3 max pool (zero pad participates) fused with 1x1x1
    conv + folded BN + ReLU, for one (batch, t) output slice.

    xm/xc/xp: (1, 1, H+2, W+2, Cin)   w: (Cin, Cout)
    scale/shift: (1, Cout)            o: (1, H*W, Cout)
    """
    t = pl.program_id(1)
    nt = pl.num_programs(1)
    prev_valid = (t > 0).astype(jnp.float32)
    next_valid = (t < nt - 1).astype(jnp.float32)

    # Separable max: temporal first (boundary slices masked to zero == zero
    # padding), then W, then H.  H/W halo columns/rows are already zero.
    a = jnp.maximum(xm_ref[...][0, 0] * prev_valid, xc_ref[...][0, 0])
    a = jnp.maximum(a, xp_ref[...][0, 0] * next_valid)     # (H+2, W+2, C)
    mw = jnp.maximum(jnp.maximum(a[:, 0:W, :], a[:, 1:W + 1, :]),
                     a[:, 2:W + 2, :])                     # (H+2, W, C)
    mh = jnp.maximum(jnp.maximum(mw[0:H], mw[1:H + 1]), mw[2:H + 2])  # (H,W,C)

    pooled = mh.reshape(H * W, mh.shape[-1])
    y = jnp.dot(pooled, w_ref[...], preferred_element_type=jnp.float32)
    y = y * scale_ref[...] + shift_ref[...]
    o_ref[0] = jnp.maximum(y, 0.0).astype(o_ref.dtype)


# --------------------------------------------------------------------------
# Wrappers (reshape / halo pad / pallas_call plumbing)
# --------------------------------------------------------------------------

def pointwise_bn_relu(x, w, scale, shift, *, tile_m=512):
    """x: (N, T, H, W, Cin) NDHWC -> (N, T, H, W, Cout); row-tiled matmul."""
    n, tt, h, wd, cin = x.shape
    cout = w.shape[1]
    m = n * tt * h * wd
    xf = x.reshape(m, cin)
    tm = min(tile_m, m)
    tm = max(8, (tm // 8) * 8)
    out = pl.pallas_call(
        _pw_conv_bn_relu_kernel,
        out_shape=jax.ShapeDtypeStruct((m, cout), jnp.float32),
        grid=(pl.cdiv(m, tm),),
        in_specs=[
            pl.BlockSpec((tm, cin), lambda i: (i, 0)),
            pl.BlockSpec((cin, cout), lambda i: (0, 0)),
            pl.BlockSpec((1, cout), lambda i: (0, 0)),
            pl.BlockSpec((1, cout), lambda i: (0, 0)),
        ],
        out_specs=pl.BlockSpec((tm, cout), lambda i: (i, 0)),
        compiler_params=pltpu.CompilerParams(
            dimension_semantics=("parallel",)),
    )(xf, w, scale.reshape(1, cout), shift.reshape(1, cout))
    return out.reshape(n, tt, h, wd, cout)


def unit3d_3x3x3(x, w, scale, shift):
    """x: (N, T, H, W, Cin) -> (N, T, H, W, Cout), TF-SAME 3x3x3 conv+BN+ReLU."""
    n, tt, h, wd, cin = x.shape
    cout = w.shape[-1]
    # 1-pixel H/W halo in the wrapper; temporal halo handled via index maps.
    xp = jnp.pad(x, ((0, 0), (0, 0), (1, 1), (1, 1), (0, 0)))
    w_r = w.reshape(3, 9 * cin, cout)            # rows ordered (kd)(kh,kw,ci)
    kern = functools.partial(_conv3x3x3_bn_relu_kernel, H=h, W=wd)
    out = pl.pallas_call(
        kern,
        out_shape=jax.ShapeDtypeStruct((n * tt, h * wd, cout), jnp.float32),
        grid=(n, tt),
        in_specs=[
            pl.BlockSpec((1, 1, h + 2, wd + 2, cin),
                         lambda b, i: (b, jnp.maximum(i - 1, 0), 0, 0, 0)),
            pl.BlockSpec((1, 1, h + 2, wd + 2, cin),
                         lambda b, i: (b, i, 0, 0, 0)),
            pl.BlockSpec((1, 1, h + 2, wd + 2, cin),
                         lambda b, i: (b, jnp.minimum(i + 1, tt - 1), 0, 0, 0)),
            pl.BlockSpec((3, 9 * cin, cout), lambda b, i: (0, 0, 0)),
            pl.BlockSpec((1, cout), lambda b, i: (0, 0)),
            pl.BlockSpec((1, cout), lambda b, i: (0, 0)),
        ],
        out_specs=pl.BlockSpec((1, h * wd, cout),
                               lambda b, i: (b * tt + i, 0, 0)),
        scratch_shapes=[pltpu.VMEM((h * wd, cout), jnp.float32)],
        compiler_params=pltpu.CompilerParams(
            dimension_semantics=("parallel", "parallel")),
    )(xp, xp, xp, w_r, scale.reshape(1, cout), shift.reshape(1, cout))
    return out.reshape(n, tt, h, wd, cout)


def maxpool_unit3d_1x1(x, w, scale, shift):
    """TF-SAME 3x3x3 max pool fused with a 1x1x1 Unit3D (conv+BN+ReLU)."""
    n, tt, h, wd, cin = x.shape
    cout = w.shape[1]
    xp = jnp.pad(x, ((0, 0), (0, 0), (1, 1), (1, 1), (0, 0)))
    kern = functools.partial(_maxpool_unit1x1_kernel, H=h, W=wd)
    out = pl.pallas_call(
        kern,
        out_shape=jax.ShapeDtypeStruct((n * tt, h * wd, cout), jnp.float32),
        grid=(n, tt),
        in_specs=[
            pl.BlockSpec((1, 1, h + 2, wd + 2, cin),
                         lambda b, i: (b, jnp.maximum(i - 1, 0), 0, 0, 0)),
            pl.BlockSpec((1, 1, h + 2, wd + 2, cin),
                         lambda b, i: (b, i, 0, 0, 0)),
            pl.BlockSpec((1, 1, h + 2, wd + 2, cin),
                         lambda b, i: (b, jnp.minimum(i + 1, tt - 1), 0, 0, 0)),
            pl.BlockSpec((cin, cout), lambda b, i: (0, 0)),
            pl.BlockSpec((1, cout), lambda b, i: (0, 0)),
            pl.BlockSpec((1, cout), lambda b, i: (0, 0)),
        ],
        out_specs=pl.BlockSpec((1, h * wd, cout),
                               lambda b, i: (b * tt + i, 0, 0)),
        compiler_params=pltpu.CompilerParams(
            dimension_semantics=("parallel", "parallel")),
    )(xp, xp, xp, w, scale.reshape(1, cout), shift.reshape(1, cout))
    return out.reshape(n, tt, h, wd, cout)


def mixed_forward(x_ncdhw, params):
    """Mixed inception block. x: (N, C, T, H, W) -> (N, sum(Cout), T, H, W)."""
    x = jnp.transpose(x_ncdhw, (0, 2, 3, 4, 1))          # NCDHW -> NDHWC

    # Fuse the three 1x1x1 branches that consume x into one lane-dense matmul.
    w0, s0, b0 = params["b0"]
    w1a, s1a, b1a = params["b1a"]
    w2a, s2a, b2a = params["b2a"]
    c0, c1a = w0.shape[1], w1a.shape[1]
    w_cat = jnp.concatenate([w0, w1a, w2a], axis=1)
    s_cat = jnp.concatenate([s0, s1a, s2a], axis=0)
    b_cat = jnp.concatenate([b0, b1a, b2a], axis=0)
    fused = pointwise_bn_relu(x, w_cat, s_cat, b_cat)

    o0 = fused[..., :c0]
    m1 = fused[..., c0:c0 + c1a]
    m2 = fused[..., c0 + c1a:]

    o1 = unit3d_3x3x3(m1, *params["b1b"])
    o2 = unit3d_3x3x3(m2, *params["b2b"])
    o3 = maxpool_unit3d_1x1(x, *params["b3"])

    out = jnp.concatenate([o0, o1, o2, o3], axis=-1)     # concat on channels
    return jnp.transpose(out, (0, 4, 1, 2, 3))           # NDHWC -> NCDHW


# --------------------------------------------------------------------------
# Deterministic parameter construction (Conv weight + eval-mode BN fold)
# --------------------------------------------------------------------------

def make_unit_params(key, cin, cout, ksize):
    k1, k2, k3, k4, k5 = jax.random.split(key, 5)
    if ksize == 1:
        w = jax.random.normal(k1, (cin, cout), jnp.float32) * 0.1
    else:
        w = jax.random.normal(k1, (3, 3, 3, cin, cout), jnp.float32) * 0.05
    gamma = 1.0 + 0.1 * jax.random.normal(k2, (cout,), jnp.float32)
    beta = 0.1 * jax.random.normal(k3, (cout,), jnp.float32)
    mean = 0.1 * jax.random.normal(k4, (cout,), jnp.float32)
    var = jnp.abs(jax.random.normal(k5, (cout,), jnp.float32)) + 0.5
    eps = 1e-5
    scale = gamma / jnp.sqrt(var + eps)     # folded eval-mode BN
    shift = beta - mean * scale
    return w, scale, shift


# --------------------------------------------------------------------------
# Pure-JAX reference (for correctness check only)
# --------------------------------------------------------------------------

def _ref_unit_1x1(x, w, scale, shift):
    y = jnp.einsum("nthwc,co->nthwo", x, w)
    return jnp.maximum(y * scale + shift, 0.0)


def _ref_unit_3x3(x, w, scale, shift):
    y = lax.conv_general_dilated(
        x, w, window_strides=(1, 1, 1),
        padding=((1, 1), (1, 1), (1, 1)),
        dimension_numbers=("NDHWC", "DHWIO", "NDHWC"))
    return jnp.maximum(y * scale + shift, 0.0)


def _ref_maxpool(x):
    xp = jnp.pad(x, ((0, 0), (1, 1), (1, 1), (1, 1), (0, 0)))
    return lax.reduce_window(xp, -jnp.inf, lax.max,
                             (1, 3, 3, 3, 1), (1, 1, 1, 1, 1), "VALID")


def ref_mixed_forward(x_ncdhw, params):
    x = jnp.transpose(x_ncdhw, (0, 2, 3, 4, 1))
    o0 = _ref_unit_1x1(x, *params["b0"])
    o1 = _ref_unit_1x1(x, *params["b1a"])
    o1 = _ref_unit_3x3(o1, *params["b1b"])
    o2 = _ref_unit_1x1(x, *params["b2a"])
    o2 = _ref_unit_3x3(o2, *params["b2b"])
    o3 = _ref_maxpool(x)
    o3 = _ref_unit_1x1(o3, *params["b3"])
    out = jnp.concatenate([o0, o1, o2, o3], axis=-1)
    return jnp.transpose(out, (0, 4, 1, 2, 3))


# --------------------------------------------------------------------------

if __name__ == "__main__":
    key = jax.random.PRNGKey(0)
    keys = jax.random.split(key, 8)

    N, Cin, T, H, W = 2, 16, 4, 8, 16
    out_channels = [8, 8, 16, 8, 16, 8]   # Mixed(out_channels) as in I3D

    x = jax.random.normal(keys[0], (N, Cin, T, H, W), jnp.float32)

    params = {
        "b0":  make_unit_params(keys[1], Cin, out_channels[0], 1),
        "b1a": make_unit_params(keys[2], Cin, out_channels[1], 1),
        "b1b": make_unit_params(keys[3], out_channels[1], out_channels[2], 3),
        "b2a": make_unit_params(keys[4], Cin, out_channels[3], 1),
        "b2b": make_unit_params(keys[5], out_channels[3], out_channels[4], 3),
        "b3":  make_unit_params(keys[6], Cin, out_channels[5], 1),
    }

    out = jax.block_until_ready(mixed_forward(x, params))
    ref = jax.block_until_ready(ref_mixed_forward(x, params))

    c_total = (out_channels[0] + out_channels[2]
               + out_channels[4] + out_channels[5])
    assert out.shape == (N, c_total, T, H, W), out.shape
    assert jnp.allclose(out, ref, atol=2e-3, rtol=2e-3), float(
        jnp.max(jnp.abs(out - ref)))

    print("KERNEL_OK")
</pallas_src>

<mosaic_0001>
module attributes {stable_mosaic.version = 11 : i64} {
  func.func @_pw_conv_bn_relu_kernel(%arg0: i32, %arg1: memref<512x16xf32, #tpu.memory_space<vmem>>, %arg2: memref<16x24xf32, #tpu.memory_space<vmem>>, %arg3: memref<1x24xf32, #tpu.memory_space<vmem>>, %arg4: memref<1x24xf32, #tpu.memory_space<vmem>>, %arg5: memref<512x24xf32, #tpu.memory_space<vmem>>) attributes {dimension_semantics = [#tpu.dimension_semantics<parallel>], iteration_bounds = array<i64: 2>, scalar_prefetch = 0 : i64, scratch_operands = 0 : i64, tpu.core_type = #tpu.core_type<tc>, window_params = [{transform_indices = @transform_0, window_bounds = array<i64: 512, 16>}, {pipeline_mode = #tpu.pipeline_mode<synchronous>, transform_indices = @transform_1, window_bounds = array<i64: 16, 24>}, {pipeline_mode = #tpu.pipeline_mode<synchronous>, transform_indices = @transform_2, window_bounds = array<i64: 1, 24>}, {pipeline_mode = #tpu.pipeline_mode<synchronous>, transform_indices = @transform_3, window_bounds = array<i64: 1, 24>}, {transform_indices = @transform_4, window_bounds = array<i64: 512, 24>}]} {
    %c0 = arith.constant 0 : index
    %c0_0 = arith.constant 0 : index
    %0 = vector.load %arg1[%c0, %c0_0] : memref<512x16xf32, #tpu.memory_space<vmem>>, vector<512x16xf32>
    %c0_1 = arith.constant 0 : index
    %c0_2 = arith.constant 0 : index
    %1 = vector.load %arg2[%c0_1, %c0_2] : memref<16x24xf32, #tpu.memory_space<vmem>>, vector<16x24xf32>
    %cst = arith.constant dense<0.000000e+00> : vector<512x24xf32>
    %2 = tpu.matmul %0, %1, %cst {dimension_numbers = #tpu.dot_dimension_numbers<[1], [0], [0], [1], [0, 0, 1, 1], [], []>} : vector<512x16xf32>, vector<16x24xf32>, vector<512x24xf32> -> vector<512x24xf32>
    %c0_3 = arith.constant 0 : index
    %c0_4 = arith.constant 0 : index
    %3 = vector.load %arg3[%c0_3, %c0_4] : memref<1x24xf32, #tpu.memory_space<vmem>>, vector<1x24xf32>
    %4 = vector.broadcast %3 : vector<1x24xf32> to vector<512x24xf32>
    %5 = arith.mulf %2, %4 : vector<512x24xf32>
    %c0_5 = arith.constant 0 : index
    %c0_6 = arith.constant 0 : index
    %6 = vector.load %arg4[%c0_5, %c0_6] : memref<1x24xf32, #tpu.memory_space<vmem>>, vector<1x24xf32>
    %7 = vector.broadcast %6 : vector<1x24xf32> to vector<512x24xf32>
    %8 = arith.addf %5, %7 : vector<512x24xf32>
    %cst_7 = arith.constant 0.000000e+00 : f32
    %9 = vector.broadcast %cst_7 : f32 to vector<512x24xf32>
    %10 = arith.maximumf %8, %9 : vector<512x24xf32>
    %c0_8 = arith.constant 0 : index
    %c0_9 = arith.constant 0 : index
    %11 = vector.load %arg5[%c0_8, %c0_9] : memref<512x24xf32, #tpu.memory_space<vmem>>, vector<512x24xf32>
    tpu.vector_store %arg5[%c0_8, %c0_9], %10 {strides = array<i32>} : memref<512x24xf32, #tpu.memory_space<vmem>>, vector<512x24xf32>,
    return
  }
  func.func @transform_0(%arg0: i32) -> (i32, i32) {
    %c0_i32 = arith.constant 0 : i32
    %c0_i32_0 = arith.constant 0 : i32
    return %arg0, %c0_i32 : i32, i32
  }
  func.func @transform_1(%arg0: i32) -> (i32, i32) {
    %c0_i32 = arith.constant 0 : i32
    %c0_i32_0 = arith.constant 0 : i32
    %c0_i32_1 = arith.constant 0 : i32
    return %c0_i32, %c0_i32_0 : i32, i32
  }
  func.func @transform_2(%arg0: i32) -> (i32, i32) {
    %c0_i32 = arith.constant 0 : i32
    %c0_i32_0 = arith.constant 0 : i32
    %c0_i32_1 = arith.constant 0 : i32
    return %c0_i32, %c0_i32_0 : i32, i32
  }
  func.func @transform_3(%arg0: i32) -> (i32, i32) {
    %c0_i32 = arith.constant 0 : i32
    %c0_i32_0 = arith.constant 0 : i32
    %c0_i32_1 = arith.constant 0 : i32
    return %c0_i32, %c0_i32_0 : i32, i32
  }
  func.func @transform_4(%arg0: i32) -> (i32, i32) {
    %c0_i32 = arith.constant 0 : i32
    %c0_i32_0 = arith.constant 0 : i32
    return %arg0, %c0_i32 : i32, i32
  }
}

</mosaic_0001>

<bundles_post_ra>
// kernel: tpu_custom_call.1
= control target key start
LH: loop header
LB: loop body
LE: loop exit
PB: predicated region body
PF: predicated region fallthrough
CT: control target
= control target key end

     0   :  { %s1462_s15 = smov 0   ;;  %s1890_s0 = inlined_call_operand.vmem [shape: f32[1024,16], index: 0, kind: input, shape index: {}]   ;;  %s1891_s1 = inlined_call_operand.vmem [shape: f32[16,24], index: 1, kind: input, shape index: {}]   ;;  %s1892_s2 = inlined_call_operand.vmem [shape: f32[1,24], index: 2, kind: input, shape index: {}]   ;;  %s1893_s3 = inlined_call_operand.vmem [shape: f32[1,24], index: 3, kind: input, shape index: {}]   ;;  %s1894_s4 = inlined_call_operand.vmem [shape: f32[1024,24], index: 4, kind: output, shape index: {}]  }
   0x1 LB: > { %s1172_s16 = sadd.s32 4294967295, %s1435_s15   ;;  %p1176_p0 = scmp.ge.s32.totalorder %s1435_s15, 1  ;;  %s1435_s15 = sphi %s1462_s15, %s14_s15  }
   0x2   : > { %p163_p1 = scmp.lt.s32.totalorder %s1435_s15, 3 }
   0x4   : > { %p164_p2 = pnand %p1176_p0, %p163_p1 }
   0x5   : > { %v265_v0 = vld [vmem:[%s1891_s1] sm:$0xff] (!%p164_p2)  ;;  %v266_v1 = vld [vmem:[%s1891_s1 + $0x8] sm:$0xff] (!%p164_p2)  ;;  %s1177_s21 = sshll.u32 (!%p164_p2), %s1172_s16, 6  ;;  %vm267_vm0 = vcmask (!%p164_p2), 130048   ;;  %vm1051_vm1 = vcmask (!%p164_p2), 195584  }
   0x6   : > { %167 = sbr.rel (%p164_p2) target bundleno = 299 (0x12b), region = 36  ;;  %v1415_v2 = vpack.c.bf16 (!%p164_p2), %v266_v1, %v265_v0  ;;  %p190_p3 = scmp.lt.s32.totalorder (!%p164_p2), %s1177_s21, 127 }
   0x8   : > { %1416 = vmatprep.subr.bf16.mxu0 (!%p164_p2), %v1415_v2  ;;  %1419 = vmatprep.subr.bf16.mxu1 (!%p164_p2), %v1415_v2 }
   0x9   : > { %1418 = vmatpush3.bf16.msra.mxu0 (!%p164_p2), %v1415_v2  ;;  %1420 = vmatpush3.bf16.msra.mxu1 (!%p164_p2), %v1415_v2 }
   0xd   : > { %s1896_s21 = smov (!%p190_p3, %s1177_s21), 127 }
   0xe   : > { %s1178_s22 = sshll.u32 %s1896_s21, 3 }
   0xf   : > { %s1484_s25 = scalar_lea.vmem %s1890_s0, %s1178_s22  ;;  %s1635_s6 = scalar_lea.vmem %s1894_s4, %s1178_s22 }
  0x10   : > { %v201_v3 = vld [vmem:[%s1484_s25] sm:$0xff]  ;;  %v202_v5 = vld [vmem:[%s1484_s25 + $0x8] sm:$0xff]  ;;  %v203_v7 = vld [vmem:[%s1484_s25 + $0x10] sm:$0xff] }
  0x11   : > { %v233_v4 = vld [vmem:[%s1484_s25 + $0x100] sm:$0xff]  ;;  %1319 = vmatprep.mubr.msk.f32.mxu0 %vm267_vm0, %v201_v3  ;;  %v234_v6 = vld [vmem:[%s1484_s25 + $0x108] sm:$0xff]  ;;  %v235_v8 = vld [vmem:[%s1484_s25 + $0x110] sm:$0xff] }
  0x12   : > { %1367 = vmatprep.mubr.msk.f32.mxu1 %vm267_vm0, %v233_v4  ;;  %1320 = vmatmul.mubr.msk.f32.vlgmr.msra.gmra.mrb[0].mxu0 %vm267_vm0, %v202_v5  ;;  %v204_v9 = vld [vmem:[%s1484_s25 + $0x18] sm:$0xff]  ;;  %v205_v11 = vld [vmem:[%s1484_s25 + $0x20] sm:$0xff]  ;;  %v206_v13 = vld [vmem:[%s1484_s25 + $0x28] sm:$0xff] }
  0x13   : > { %1368 = vmatmul.mubr.msk.f32.vlgmr.msra.gmra.mrb[0].mxu1 %vm267_vm0, %v234_v6  ;;  %1322 = vmatprep.mubr.msk.f32.mxu0 %vm267_vm0, %v203_v7  ;;  %v236_v10 = vld [vmem:[%s1484_s25 + $0x118] sm:$0xff]  ;;  %v237_v12 = vld [vmem:[%s1484_s25 + $0x120] sm:$0xff]  ;;  %v238_v14 = vld [vmem:[%s1484_s25 + $0x128] sm:$0xff] }
  0x14   : > { %1370 = vmatprep.mubr.msk.f32.mxu1 %vm267_vm0, %v235_v8  ;;  %v207_v15 = vld [vmem:[%s1484_s25 + $0x30] sm:$0xff]  ;;  %v208_v17 = vld [vmem:[%s1484_s25 + $0x38] sm:$0xff]  ;;  %v209_v19 = vld [vmem:[%s1484_s25 + $0x40] sm:$0xff] }
  0x15   : > { %v239_v16 = vld [vmem:[%s1484_s25 + $0x130] sm:$0xff]  ;;  %v240_v18 = vld [vmem:[%s1484_s25 + $0x138] sm:$0xff]  ;;  %v241_v20 = vld [vmem:[%s1484_s25 + $0x140] sm:$0xff] }
  0x16   : > { %1323 = vmatmul.mubr.msk.f32.gmra.mrb[2].mxu0 %vm267_vm0, %v204_v9  ;;  %v210_v21 = vld [vmem:[%s1484_s25 + $0x48] sm:$0xff]  ;;  %v211_v23 = vld [vmem:[%s1484_s25 + $0x50] sm:$0xff]  ;;  %v212_v25 = vld [vmem:[%s1484_s25 + $0x58] sm:$0xff] }
  0x17   : > { %1371 = vmatmul.mubr.msk.f32.gmra.mrb[2].mxu1 %vm267_vm0, %v236_v10  ;;  %1325 = vmatprep.mubr.msk.f32.mxu0 %vm267_vm0, %v205_v11  ;;  %v242_v22 = vld [vmem:[%s1484_s25 + $0x148] sm:$0xff]  ;;  %v243_v24 = vld [vmem:[%s1484_s25 + $0x150] sm:$0xff]  ;;  %v244_v26 = vld [vmem:[%s1484_s25 + $0x158] sm:$0xff] }
  0x18   : > { %1373 = vmatprep.mubr.msk.f32.mxu1 %vm267_vm0, %v237_v12  ;;  %v213_v27 = vld [vmem:[%s1484_s25 + $0x60] sm:$0xff]  ;;  %v214_v29 = vld [vmem:[%s1484_s25 + $0x68] sm:$0xff]  ;;  %v215_v31 = vld [vmem:[%s1484_s25 + $0x70] sm:$0xff] }
  0x19   : > { %v245_v28 = vld [vmem:[%s1484_s25 + $0x160] sm:$0xff]  ;;  %v246_v30 = vld [vmem:[%s1484_s25 + $0x168] sm:$0xff]  ;;  %v247_v32 = vld [vmem:[%s1484_s25 + $0x170] sm:$0xff] }
  0x1a   : > { %1326 = vmatmul.mubr.msk.f32.gmra.mrb[4].mxu0 %vm267_vm0, %v206_v13  ;;  %v216_v33 = vld [vmem:[%s1484_s25 + $0x78] sm:$0xff]  ;;  %v217_v35 = vld [vmem:[%s1484_s25 + $0x80] sm:$0xff]  ;;  %v218_v37 = vld [vmem:[%s1484_s25 + $0x88] sm:$0xff] }
  0x1b   : > { %1374 = vmatmul.mubr.msk.f32.gmra.mrb[4].mxu1 %vm267_vm0, %v238_v14  ;;  %1328 = vmatprep.mubr.msk.f32.mxu0 %vm267_vm0, %v207_v15  ;;  %v248_v34 = vld [vmem:[%s1484_s25 + $0x178] sm:$0xff]  ;;  %v249_v36 = vld [vmem:[%s1484_s25 + $0x180] sm:$0xff]  ;;  %v250_v38 = vld [vmem:[%s1484_s25 + $0x188] sm:$0xff] }
  0x1c   : > { %1376 = vmatprep.mubr.msk.f32.mxu1 %vm267_vm0, %v239_v16  ;;  %v219_v39 = vld [vmem:[%s1484_s25 + $0x90] sm:$0xff]  ;;  %v220_v41 = vld [vmem:[%s1484_s25 + $0x98] sm:$0xff]  ;;  %v221_v43 = vld [vmem:[%s1484_s25 + $0xa0] sm:$0xff] }
  0x1d   : > { %v251_v40 = vld [vmem:[%s1484_s25 + $0x190] sm:$0xff]  ;;  %v252_v42 = vld [vmem:[%s1484_s25 + $0x198] sm:$0xff]  ;;  %v253_v44 = vld [vmem:[%s1484_s25 + $0x1a0] sm:$0xff] }
  0x1e   : > { %1329 = vmatmul.mubr.msk.f32.gmra.mrb[6].mxu0 %vm267_vm0, %v208_v17  ;;  %v222_v45 = vld [vmem:[%s1484_s25 + $0xa8] sm:$0xff]  ;;  %v223_v47 = vld [vmem:[%s1484_s25 + $0xb0] sm:$0xff]  ;;  %v224_v49 = vld [vmem:[%s1484_s25 + $0xb8] sm:$0xff] }
  0x1f   : > { %1377 = vmatmul.mubr.msk.f32.gmra.mrb[6].mxu1 %vm267_vm0, %v240_v18  ;;  %1331 = vmatprep.mubr.msk.f32.mxu0 %vm267_vm0, %v209_v19  ;;  %v254_v46 = vld [vmem:[%s1484_s25 + $0x1a8] sm:$0xff]  ;;  %v255_v48 = vld [vmem:[%s1484_s25 + $0x1b0] sm:$0xff]  ;;  %v256_v50 = vld [vmem:[%s1484_s25 + $0x1b8] sm:$0xff] }
  0x20   : > { %1379 = vmatprep.mubr.msk.f32.mxu1 %vm267_vm0, %v241_v20  ;;  %v225_v51 = vld [vmem:[%s1484_s25 + $0xc0] sm:$0xff]  ;;  %v226_v53 = vld [vmem:[%s1484_s25 + $0xc8] sm:$0xff]  ;;  %v227_v55 = vld [vmem:[%s1484_s25 + $0xd0] sm:$0xff] }
  0x21   : > { %v257_v52 = vld [vmem:[%s1484_s25 + $0x1c0] sm:$0xff]  ;;  %v258_v54 = vld [vmem:[%s1484_s25 + $0x1c8] sm:$0xff]  ;;  %v259_v56 = vld [vmem:[%s1484_s25 + $0x1d0] sm:$0xff] }
  0x22   : > { %1332 = vmatmul.mubr.msk.f32.gmra.mrb[8].mxu0 %vm267_vm0, %v210_v21  ;;  %v228_v57 = vld [vmem:[%s1484_s25 + $0xd8] sm:$0xff]  ;;  %v229_v59 = vld [vmem:[%s1484_s25 + $0xe0] sm:$0xff]  ;;  %v230_v61 = vld [vmem:[%s1484_s25 + $0xe8] sm:$0xff] }
  0x23   : > { %1380 = vmatmul.mubr.msk.f32.gmra.mrb[8].mxu1 %vm267_vm0, %v242_v22  ;;  %1334 = vmatprep.mubr.msk.f32.mxu0 %vm267_vm0, %v211_v23  ;;  %v260_v58 = vld [vmem:[%s1484_s25 + $0x1d8] sm:$0xff]  ;;  %v261_v60 = vld [vmem:[%s1484_s25 + $0x1e0] sm:$0xff]  ;;  %v262_v62 = vld [vmem:[%s1484_s25 + $0x1e8] sm:$0xff] }
  0x24   : > { %1382 = vmatprep.mubr.msk.f32.mxu1 %vm267_vm0, %v243_v24  ;;  %v231_v63 = vld [vmem:[%s1484_s25 + $0xf0] sm:$0xff]  ;;  %v232_v1 = vld [vmem:[%s1484_s25 + $0xf8] sm:$0xff]  ;;  %v1617_v3 = vld [vmem:[%s1892_s2] ss:$0 sm:$0xff] }
  0x25   : > { %v263_v0 = vld [vmem:[%s1484_s25 + $0x1f0] sm:$0xff]  ;;  %v264_v2 = vld [vmem:[%s1484_s25 + $0x1f8] sm:$0xff]  ;;  %v1622_v5 = vld [vmem:[%s1893_s3] ss:$0 sm:$0xff] }
  0x26   : > { %1335 = vmatmul.mubr.msk.f32.gmra.mrb[10].mxu0 %vm267_vm0, %v212_v25 }
  0x27   : > { %1383 = vmatmul.mubr.msk.f32.gmra.mrb[10].mxu1 %vm267_vm0, %v244_v26  ;;  %1337 = vmatprep.mubr.msk.f32.mxu0 %vm267_vm0, %v213_v27 }
  0x28   : > { %1385 = vmatprep.mubr.msk.f32.mxu1 %vm267_vm0, %v245_v28 }
  0x2a   : > { %1338 = vmatmul.mubr.msk.f32.gmra.mrb[12].mxu0 %vm267_vm0, %v214_v29 }
  0x2b   : > { %1386 = vmatmul.mubr.msk.f32.gmra.mrb[12].mxu1 %vm267_vm0, %v246_v30  ;;  %1340 = vmatprep.mubr.msk.f32.mxu0 %vm267_vm0, %v215_v31 }
  0x2c   : > { %1388 = vmatprep.mubr.msk.f32.mxu1 %vm267_vm0, %v247_v32 }
  0x2e   : > { %1341 = vmatmul.mubr.msk.f32.gmra.mrb[14].mxu0 %vm267_vm0, %v216_v33 }
  0x2f   : > { %1389 = vmatmul.mubr.msk.f32.gmra.mrb[14].mxu1 %vm267_vm0, %v248_v34  ;;  %1343 = vmatprep.mubr.msk.f32.mxu0 %vm267_vm0, %v217_v35 }
  0x30   : > { %1391 = vmatprep.mubr.msk.f32.mxu1 %vm267_vm0, %v249_v36 }
  0x32   : > { %1344 = vmatmul.mubr.msk.f32.gmra.mrb[16].mxu0 %vm267_vm0, %v218_v37 }
  0x33   : > { %1392 = vmatmul.mubr.msk.f32.gmra.mrb[16].mxu1 %vm267_vm0, %v250_v38  ;;  %1346 = vmatprep.mubr.msk.f32.mxu0 %vm267_vm0, %v219_v39 }
  0x34   : > { %1394 = vmatprep.mubr.msk.f32.mxu1 %vm267_vm0, %v251_v40 }
  0x36   : > { %1347 = vmatmul.mubr.msk.f32.gmra.mrb[18].mxu0 %vm267_vm0, %v220_v41 }
  0x37   : > { %1395 = vmatmul.mubr.msk.f32.gmra.mrb[18].mxu1 %vm267_vm0, %v252_v42  ;;  %1349 = vmatprep.mubr.msk.f32.mxu0 %vm267_vm0, %v221_v43 }
  0x38   : > { %1397 = vmatprep.mubr.msk.f32.mxu1 %vm267_vm0, %v253_v44 }
  0x3a   : > { %1350 = vmatmul.mubr.msk.f32.gmra.mrb[20].mxu0 %vm267_vm0, %v222_v45 }
  0x3b   : > { %1398 = vmatmul.mubr.msk.f32.gmra.mrb[20].mxu1 %vm267_vm0, %v254_v46  ;;  %1352 = vmatprep.mubr.msk.f32.mxu0 %vm267_vm0, %v223_v47 }
  0x3c   : > { %1400 = vmatprep.mubr.msk.f32.mxu1 %vm267_vm0, %v255_v48 }
  0x3e   : > { %1353 = vmatmul.mubr.msk.f32.gmra.mrb[22].mxu0 %vm267_vm0, %v224_v49 }
  0x3f   : > { %1401 = vmatmul.mubr.msk.f32.gmra.mrb[22].mxu1 %vm267_vm0, %v256_v50  ;;  %1355 = vmatprep.mubr.msk.f32.mxu0 %vm267_vm0, %v225_v51 }
  0x40   : > { %1403 = vmatprep.mubr.msk.f32.mxu1 %vm267_vm0, %v257_v52 }
  0x42   : > { %1356 = vmatmul.mubr.msk.f32.gmra.mrb[24].mxu0 %vm267_vm0, %v226_v53 }
  0x43   : > { %1404 = vmatmul.mubr.msk.f32.gmra.mrb[24].mxu1 %vm267_vm0, %v258_v54  ;;  %1358 = vmatprep.mubr.msk.f32.mxu0 %vm267_vm0, %v227_v55 }
  0x44   : > { %1406 = vmatprep.mubr.msk.f32.mxu1 %vm267_vm0, %v259_v56 }
  0x46   : > { %1359 = vmatmul.mubr.msk.f32.gmra.mrb[26].mxu0 %vm267_vm0, %v228_v57 }
  0x47   : > { %1407 = vmatmul.mubr.msk.f32.gmra.mrb[26].mxu1 %vm267_vm0, %v260_v58  ;;  %1361 = vmatprep.mubr.msk.f32.mxu0 %vm267_vm0, %v229_v59 }
  0x48   : > { %1409 = vmatprep.mubr.msk.f32.mxu1 %vm267_vm0, %v261_v60 }
  0x4a   : > { %1362 = vmatmul.mubr.msk.f32.gmra.mrb[28].mxu0 %vm267_vm0, %v230_v61 }
  0x4b   : > { %1410 = vmatmul.mubr.msk.f32.gmra.mrb[28].mxu1 %vm267_vm0, %v262_v62  ;;  %1364 = vmatprep.mubr.msk.f32.mxu0 %vm267_vm0, %v231_v63 }
  0x4c   : > { %1412 = vmatprep.mubr.msk.f32.mxu1 %vm267_vm0, %v263_v0 }
  0x4e   : > { %1365 = vmatmul.mubr.msk.f32.gmra.mrb[30].mxu0 %vm267_vm0, %v232_v1 }
  0x4f   : > { %1413 = vmatmul.mubr.msk.f32.gmra.mrb[30].mxu1 %vm267_vm0, %v264_v2 }
  0xe5   : > { %v1321_v4 = vpop.f32.mrb[0].mxu0 }
  0xe6   : > { %v1369_v6 = vpop.f32.mrb[0].mxu1  ;;  %v853_v7 = vmul.f32 %v1321_v4, %v1617_v3  ;;  %v526_v9 = vpop.f32.mrb[1].mxu0 }
  0xe7   : > { %v885_v8 = vmul.f32 %v1369_v6, %v1617_v3  ;;  %v686_v10 = vpop.f32.mrb[1].mxu1  ;;  %v852_v11 = vmul.f32 %v1617_v3, %v526_v9 }
  0xe8   : > { %v884_v12 = vmul.f32 %v1617_v3, %v686_v10  ;;  %v924_v13 = vadd.f32 %v1622_v5, %v853_v7 }
  0xe9   : > { %v956_v14 = vadd.f32 %v1622_v5, %v885_v8  ;;  %v923_v15 = vadd.f32 %v1622_v5, %v852_v11  ;;  %v1324_v17 = vpop.f32.mrb[2].mxu0 }
  0xea   : > { %v955_v16 = vadd.f32 %v1622_v5, %v884_v12  ;;  %v1372_v18 = vpop.f32.mrb[2].mxu1  ;;  %v988_v19 = vmax.f32 %v924_v13, 0.0  ;;  %v855_v21 = vmul.f32 %v1324_v17, %v1617_v3  ;;  %v536_v23 = vpop.f32.mrb[3].mxu0 }
  0xeb   : > { %v1020_v20 = vmax.f32 %v956_v14, 0.0  ;;  %v887_v22 = vmul.f32 %v1372_v18, %v1617_v3  ;;  %v696_v24 = vpop.f32.mrb[3].mxu1  ;;  %v987_v25 = vmax.f32 %v923_v15, 0.0  ;;  %v854_v27 = vmul.f32 %v1617_v3, %v536_v23 }
  0xec   : > { %v1019_v26 = vmax.f32 %v955_v16, 0.0  ;;  %v886_v28 = vmul.f32 %v1617_v3, %v696_v24  ;;  %1053 = vst.msk [vmem:[%s1635_s6 + $0x8] sm:$0xff] %vm1051_vm1, %v988_v19  ;;  %v926_v29 = vadd.f32 %v1622_v5, %v855_v21 }
  0xed   : > { %1085 = vst.msk [vmem:[%s1635_s6 + $0x108] sm:$0xff] %vm1051_vm1, %v1020_v20  ;;  %v958_v30 = vadd.f32 %v1622_v5, %v887_v22  ;;  %1052 = vst.msk [vmem:[%s1635_s6] sm:$0xff] %vm1051_vm1, %v987_v25  ;;  %v925_v31 = vadd.f32 %v1622_v5, %v854_v27  ;;  %v1327_v33 = vpop.f32.mrb[4].mxu0 }
  0xee   : > { %1084 = vst.msk [vmem:[%s1635_s6 + $0x100] sm:$0xff] %vm1051_vm1, %v1019_v26  ;;  %v957_v32 = vadd.f32 %v1622_v5, %v886_v28  ;;  %v1375_v34 = vpop.f32.mrb[4].mxu1  ;;  %v990_v35 = vmax.f32 %v926_v29, 0.0  ;;  %v857_v37 = vmul.f32 %v1327_v33, %v1617_v3  ;;  %v546_v39 = vpop.f32.mrb[5].mxu0 }
  0xef   : > { %v1022_v36 = vmax.f32 %v958_v30, 0.0  ;;  %v889_v38 = vmul.f32 %v1375_v34, %v1617_v3  ;;  %v706_v40 = vpop.f32.mrb[5].mxu1  ;;  %v989_v41 = vmax.f32 %v925_v31, 0.0  ;;  %v856_v43 = vmul.f32 %v1617_v3, %v546_v39 }
  0xf0   : > { %v1021_v42 = vmax.f32 %v957_v32, 0.0  ;;  %v888_v44 = vmul.f32 %v1617_v3, %v706_v40  ;;  %1055 = vst.msk [vmem:[%s1635_s6 + $0x18] sm:$0xff] %vm1051_vm1, %v990_v35  ;;  %v928_v45 = vadd.f32 %v1622_v5, %v857_v37 }
  0xf1   : > { %1087 = vst.msk [vmem:[%s1635_s6 + $0x118] sm:$0xff] %vm1051_vm1, %v1022_v36  ;;  %v960_v46 = vadd.f32 %v1622_v5, %v889_v38  ;;  %1054 = vst.msk [vmem:[%s1635_s6 + $0x10] sm:$0xff] %vm1051_vm1, %v989_v41  ;;  %v927_v47 = vadd.f32 %v1622_v5, %v856_v43  ;;  %v1330_v49 = vpop.f32.mrb[6].mxu0 }
  0xf2   : > { %1086 = vst.msk [vmem:[%s1635_s6 + $0x110] sm:$0xff] %vm1051_vm1, %v1021_v42  ;;  %v959_v48 = vadd.f32 %v1622_v5, %v888_v44  ;;  %v1378_v50 = vpop.f32.mrb[6].mxu1  ;;  %v992_v51 = vmax.f32 %v928_v45, 0.0  ;;  %v859_v53 = vmul.f32 %v1330_v49, %v1617_v3  ;;  %v556_v55 = vpop.f32.mrb[7].mxu0 }
  0xf3   : > { %v1024_v52 = vmax.f32 %v960_v46, 0.0  ;;  %v891_v54 = vmul.f32 %v1378_v50, %v1617_v3  ;;  %v716_v56 = vpop.f32.mrb[7].mxu1  ;;  %v991_v57 = vmax.f32 %v927_v47, 0.0  ;;  %v858_v59 = vmul.f32 %v1617_v3, %v556_v55 }
  0xf4   : > { %v1023_v58 = vmax.f32 %v959_v48, 0.0  ;;  %v890_v60 = vmul.f32 %v1617_v3, %v716_v56  ;;  %1057 = vst.msk [vmem:[%s1635_s6 + $0x28] sm:$0xff] %vm1051_vm1, %v992_v51  ;;  %v930_v61 = vadd.f32 %v1622_v5, %v859_v53 }
  0xf5   : > { %1089 = vst.msk [vmem:[%s1635_s6 + $0x128] sm:$0xff] %vm1051_vm1, %v1024_v52  ;;  %v962_v62 = vadd.f32 %v1622_v5, %v891_v54  ;;  %1056 = vst.msk [vmem:[%s1635_s6 + $0x20] sm:$0xff] %vm1051_vm1, %v991_v57  ;;  %v929_v63 = vadd.f32 %v1622_v5, %v858_v59  ;;  %v1333_v1 = vpop.f32.mrb[8].mxu0 }
  0xf6   : > { %1088 = vst.msk [vmem:[%s1635_s6 + $0x120] sm:$0xff] %vm1051_vm1, %v1023_v58  ;;  %v961_v0 = vadd.f32 %v1622_v5, %v890_v60  ;;  %v1381_v2 = vpop.f32.mrb[8].mxu1  ;;  %v994_v4 = vmax.f32 %v930_v61, 0.0  ;;  %v861_v7 = vmul.f32 %v1333_v1, %v1617_v3  ;;  %v566_v9 = vpop.f32.mrb[9].mxu0 }
  0xf7   : > { %v1026_v6 = vmax.f32 %v962_v62, 0.0  ;;  %v893_v8 = vmul.f32 %v1381_v2, %v1617_v3  ;;  %v726_v10 = vpop.f32.mrb[9].mxu1  ;;  %v993_v11 = vmax.f32 %v929_v63, 0.0  ;;  %v860_v13 = vmul.f32 %v1617_v3, %v566_v9 }
  0xf8   : > { %v1025_v12 = vmax.f32 %v961_v0, 0.0  ;;  %v892_v14 = vmul.f32 %v1617_v3, %v726_v10  ;;  %1059 = vst.msk [vmem:[%s1635_s6 + $0x38] sm:$0xff] %vm1051_vm1, %v994_v4  ;;  %v932_v15 = vadd.f32 %v1622_v5, %v861_v7 }
  0xf9   : > { %1091 = vst.msk [vmem:[%s1635_s6 + $0x138] sm:$0xff] %vm1051_vm1, %v1026_v6  ;;  %v964_v16 = vadd.f32 %v1622_v5, %v893_v8  ;;  %1058 = vst.msk [vmem:[%s1635_s6 + $0x30] sm:$0xff] %vm1051_vm1, %v993_v11  ;;  %v931_v17 = vadd.f32 %v1622_v5, %v860_v13  ;;  %v1336_v19 = vpop.f32.mrb[10].mxu0 }
  0xfa   : > { %1090 = vst.msk [vmem:[%s1635_s6 + $0x130] sm:$0xff] %vm1051_vm1, %v1025_v12  ;;  %v963_v18 = vadd.f32 %v1622_v5, %v892_v14  ;;  %v1384_v20 = vpop.f32.mrb[10].mxu1  ;;  %v996_v21 = vmax.f32 %v932_v15, 0.0  ;;  %v863_v23 = vmul.f32 %v1336_v19, %v1617_v3  ;;  %v576_v25 = vpop.f32.mrb[11].mxu0 }
  0xfb   : > { %v1028_v22 = vmax.f32 %v964_v16, 0.0  ;;  %v895_v24 = vmul.f32 %v1384_v20, %v1617_v3  ;;  %v736_v26 = vpop.f32.mrb[11].mxu1  ;;  %v995_v27 = vmax.f32 %v931_v17, 0.0  ;;  %v862_v29 = vmul.f32 %v1617_v3, %v576_v25 }
  0xfc   : > { %v1027_v28 = vmax.f32 %v963_v18, 0.0  ;;  %v894_v30 = vmul.f32 %v1617_v3, %v736_v26  ;;  %1061 = vst.msk [vmem:[%s1635_s6 + $0x48] sm:$0xff] %vm1051_vm1, %v996_v21  ;;  %v934_v31 = vadd.f32 %v1622_v5, %v863_v23 }
  0xfd   : > { %1093 = vst.msk [vmem:[%s1635_s6 + $0x148] sm:$0xff] %vm1051_vm1, %v1028_v22  ;;  %v966_v32 = vadd.f32 %v1622_v5, %v895_v24  ;;  %1060 = vst.msk [vmem:[%s1635_s6 + $0x40] sm:$0xff] %vm1051_vm1, %v995_v27  ;;  %v933_v33 = vadd.f32 %v1622_v5, %v862_v29  ;;  %v1339_v35 = vpop.f32.mrb[12].mxu0 }
  0xfe   : > { %1092 = vst.msk [vmem:[%s1635_s6 + $0x140] sm:$0xff] %vm1051_vm1, %v1027_v28  ;;  %v965_v34 = vadd.f32 %v1622_v5, %v894_v30  ;;  %v1387_v36 = vpop.f32.mrb[12].mxu1  ;;  %v998_v37 = vmax.f32 %v934_v31, 0.0  ;;  %v865_v39 = vmul.f32 %v1339_v35, %v1617_v3  ;;  %v586_v41 = vpop.f32.mrb[13].mxu0 }
  0xff   : > { %v1030_v38 = vmax.f32 %v966_v32, 0.0  ;;  %v897_v40 = vmul.f32 %v1387_v36, %v1617_v3  ;;  %v746_v42 = vpop.f32.mrb[13].mxu1  ;;  %v997_v43 = vmax.f32 %v933_v33, 0.0  ;;  %v864_v45 = vmul.f32 %v1617_v3, %v586_v41 }
 0x100   : > { %v1029_v44 = vmax.f32 %v965_v34, 0.0  ;;  %v896_v46 = vmul.f32 %v1617_v3, %v746_v42  ;;  %1063 = vst.msk [vmem:[%s1635_s6 + $0x58] sm:$0xff] %vm1051_vm1, %v998_v37  ;;  %v936_v47 = vadd.f32 %v1622_v5, %v865_v39 }
 0x101   : > { %1095 = vst.msk [vmem:[%s1635_s6 + $0x158] sm:$0xff] %vm1051_vm1, %v1030_v38  ;;  %v968_v48 = vadd.f32 %v1622_v5, %v897_v40  ;;  %1062 = vst.msk [vmem:[%s1635_s6 + $0x50] sm:$0xff] %vm1051_vm1, %v997_v43  ;;  %v935_v49 = vadd.f32 %v1622_v5, %v864_v45  ;;  %v1342_v51 = vpop.f32.mrb[14].mxu0 }
 0x102   : > { %1094 = vst.msk [vmem:[%s1635_s6 + $0x150] sm:$0xff] %vm1051_vm1, %v1029_v44  ;;  %v967_v50 = vadd.f32 %v1622_v5, %v896_v46  ;;  %v1390_v52 = vpop.f32.mrb[14].mxu1  ;;  %v1000_v53 = vmax.f32 %v936_v47, 0.0  ;;  %v867_v55 = vmul.f32 %v1342_v51, %v1617_v3  ;;  %v596_v57 = vpop.f32.mrb[15].mxu0 }
 0x103   : > { %v1032_v54 = vmax.f32 %v968_v48, 0.0  ;;  %v899_v56 = vmul.f32 %v1390_v52, %v1617_v3  ;;  %v756_v58 = vpop.f32.mrb[15].mxu1  ;;  %v999_v59 = vmax.f32 %v935_v49, 0.0  ;;  %v866_v61 = vmul.f32 %v1617_v3, %v596_v57 }
 0x104   : > { %v1031_v60 = vmax.f32 %v967_v50, 0.0  ;;  %v898_v62 = vmul.f32 %v1617_v3, %v756_v58  ;;  %1065 = vst.msk [vmem:[%s1635_s6 + $0x68] sm:$0xff] %vm1051_vm1, %v1000_v53  ;;  %v938_v63 = vadd.f32 %v1622_v5, %v867_v55 }
 0x105   : > { %1097 = vst.msk [vmem:[%s1635_s6 + $0x168] sm:$0xff] %vm1051_vm1, %v1032_v54  ;;  %v970_v0 = vadd.f32 %v1622_v5, %v899_v56  ;;  %1064 = vst.msk [vmem:[%s1635_s6 + $0x60] sm:$0xff] %vm1051_vm1, %v999_v59  ;;  %v937_v1 = vadd.f32 %v1622_v5, %v866_v61  ;;  %v1345_v4 = vpop.f32.mrb[16].mxu0 }
 0x106   : > { %1096 = vst.msk [vmem:[%s1635_s6 + $0x160] sm:$0xff] %vm1051_vm1, %v1031_v60  ;;  %v969_v2 = vadd.f32 %v1622_v5, %v898_v62  ;;  %v1393_v6 = vpop.f32.mrb[16].mxu1  ;;  %v1002_v7 = vmax.f32 %v938_v63, 0.0  ;;  %v869_v9 = vmul.f32 %v1345_v4, %v1617_v3  ;;  %v606_v11 = vpop.f32.mrb[17].mxu0 }
 0x107   : > { %v1034_v8 = vmax.f32 %v970_v0, 0.0  ;;  %v901_v10 = vmul.f32 %v1393_v6, %v1617_v3  ;;  %v766_v12 = vpop.f32.mrb[17].mxu1  ;;  %v1001_v13 = vmax.f32 %v937_v1, 0.0  ;;  %v868_v15 = vmul.f32 %v1617_v3, %v606_v11 }
 0x108   : > { %v1033_v14 = vmax.f32 %v969_v2, 0.0  ;;  %v900_v16 = vmul.f32 %v1617_v3, %v766_v12  ;;  %1067 = vst.msk [vmem:[%s1635_s6 + $0x78] sm:$0xff] %vm1051_vm1, %v1002_v7  ;;  %v940_v17 = vadd.f32 %v1622_v5, %v869_v9 }
 0x109   : > { %1099 = vst.msk [vmem:[%s1635_s6 + $0x178] sm:$0xff] %vm1051_vm1, %v1034_v8  ;;  %v972_v18 = vadd.f32 %v1622_v5, %v901_v10  ;;  %1066 = vst.msk [vmem:[%s1635_s6 + $0x70] sm:$0xff] %vm1051_vm1, %v1001_v13  ;;  %v939_v19 = vadd.f32 %v1622_v5, %v868_v15  ;;  %v1348_v21 = vpop.f32.mrb[18].mxu0 }
 0x10a   : > { %1098 = vst.msk [vmem:[%s1635_s6 + $0x170] sm:$0xff] %vm1051_vm1, %v1033_v14  ;;  %v971_v20 = vadd.f32 %v1622_v5, %v900_v16  ;;  %v1396_v22 = vpop.f32.mrb[18].mxu1  ;;  %v1004_v23 = vmax.f32 %v940_v17, 0.0  ;;  %v871_v25 = vmul.f32 %v1348_v21, %v1617_v3  ;;  %v616_v27 = vpop.f32.mrb[19].mxu0 }
 0x10b   : > { %v1036_v24 = vmax.f32 %v972_v18, 0.0  ;;  %v903_v26 = vmul.f32 %v1396_v22, %v1617_v3  ;;  %v776_v28 = vpop.f32.mrb[19].mxu1  ;;  %v1003_v29 = vmax.f32 %v939_v19, 0.0  ;;  %v870_v31 = vmul.f32 %v1617_v3, %v616_v27 }
 0x10c   : > { %v1035_v30 = vmax.f32 %v971_v20, 0.0  ;;  %v902_v32 = vmul.f32 %v1617_v3, %v776_v28  ;;  %1069 = vst.msk [vmem:[%s1635_s6 + $0x88] sm:$0xff] %vm1051_vm1, %v1004_v23  ;;  %v942_v33 = vadd.f32 %v1622_v5, %v871_v25 }
 0x10d   : > { %1101 = vst.msk [vmem:[%s1635_s6 + $0x188] sm:$0xff] %vm1051_vm1, %v1036_v24  ;;  %v974_v34 = vadd.f32 %v1622_v5, %v903_v26  ;;  %1068 = vst.msk [vmem:[%s1635_s6 + $0x80] sm:$0xff] %vm1051_vm1, %v1003_v29  ;;  %v941_v35 = vadd.f32 %v1622_v5, %v870_v31  ;;  %v1351_v37 = vpop.f32.mrb[20].mxu0 }
 0x10e   : > { %1100 = vst.msk [vmem:[%s1635_s6 + $0x180] sm:$0xff] %vm1051_vm1, %v1035_v30  ;;  %v973_v36 = vadd.f32 %v1622_v5, %v902_v32  ;;  %v1399_v38 = vpop.f32.mrb[20].mxu1  ;;  %v1006_v39 = vmax.f32 %v942_v33, 0.0  ;;  %v873_v41 = vmul.f32 %v1351_v37, %v1617_v3  ;;  %v626_v43 = vpop.f32.mrb[21].mxu0 }
 0x10f   : > { %v1038_v40 = vmax.f32 %v974_v34, 0.0  ;;  %v905_v42 = vmul.f32 %v1399_v38, %v1617_v3  ;;  %v786_v44 = vpop.f32.mrb[21].mxu1  ;;  %v1005_v45 = vmax.f32 %v941_v35, 0.0  ;;  %v872_v47 = vmul.f32 %v1617_v3, %v626_v43 }
 0x110   : > { %v1037_v46 = vmax.f32 %v973_v36, 0.0  ;;  %v904_v48 = vmul.f32 %v1617_v3, %v786_v44  ;;  %1071 = vst.msk [vmem:[%s1635_s6 + $0x98] sm:$0xff] %vm1051_vm1, %v1006_v39  ;;  %v944_v49 = vadd.f32 %v1622_v5, %v873_v41 }
 0x111   : > { %1103 = vst.msk [vmem:[%s1635_s6 + $0x198] sm:$0xff] %vm1051_vm1, %v1038_v40  ;;  %v976_v50 = vadd.f32 %v1622_v5, %v905_v42  ;;  %1070 = vst.msk [vmem:[%s1635_s6 + $0x90] sm:$0xff] %vm1051_vm1, %v1005_v45  ;;  %v943_v51 = vadd.f32 %v1622_v5, %v872_v47  ;;  %v1354_v53 = vpop.f32.mrb[22].mxu0 }
 0x112   : > { %1102 = vst.msk [vmem:[%s1635_s6 + $0x190] sm:$0xff] %vm1051_vm1, %v1037_v46  ;;  %v975_v52 = vadd.f32 %v1622_v5, %v904_v48  ;;  %v1402_v54 = vpop.f32.mrb[22].mxu1  ;;  %v1008_v55 = vmax.f32 %v944_v49, 0.0  ;;  %v875_v57 = vmul.f32 %v1354_v53, %v1617_v3  ;;  %v636_v59 = vpop.f32.mrb[23].mxu0 }
 0x113   : > { %v1040_v56 = vmax.f32 %v976_v50, 0.0  ;;  %v907_v58 = vmul.f32 %v1402_v54, %v1617_v3  ;;  %v796_v60 = vpop.f32.mrb[23].mxu1  ;;  %v1007_v61 = vmax.f32 %v943_v51, 0.0  ;;  %v874_v63 = vmul.f32 %v1617_v3, %v636_v59 }
 0x114   : > { %v1039_v62 = vmax.f32 %v975_v52, 0.0  ;;  %v906_v0 = vmul.f32 %v1617_v3, %v796_v60  ;;  %1073 = vst.msk [vmem:[%s1635_s6 + $0xa8] sm:$0xff] %vm1051_vm1, %v1008_v55  ;;  %v946_v1 = vadd.f32 %v1622_v5, %v875_v57 }
 0x115   : > { %1105 = vst.msk [vmem:[%s1635_s6 + $0x1a8] sm:$0xff] %vm1051_vm1, %v1040_v56  ;;  %v978_v2 = vadd.f32 %v1622_v5, %v907_v58  ;;  %1072 = vst.msk [vmem:[%s1635_s6 + $0xa0] sm:$0xff] %vm1051_vm1, %v1007_v61  ;;  %v945_v4 = vadd.f32 %v1622_v5, %v874_v63  ;;  %v1357_v7 = vpop.f32.mrb[24].mxu0 }
 0x116   : > { %1104 = vst.msk [vmem:[%s1635_s6 + $0x1a0] sm:$0xff] %vm1051_vm1, %v1039_v62  ;;  %v977_v6 = vadd.f32 %v1622_v5, %v906_v0  ;;  %v1405_v8 = vpop.f32.mrb[24].mxu1  ;;  %v1010_v9 = vmax.f32 %v946_v1, 0.0  ;;  %v877_v11 = vmul.f32 %v1357_v7, %v1617_v3  ;;  %v646_v13 = vpop.f32.mrb[25].mxu0 }
 0x117   : > { %v1042_v10 = vmax.f32 %v978_v2, 0.0  ;;  %v909_v12 = vmul.f32 %v1405_v8, %v1617_v3  ;;  %v806_v14 = vpop.f32.mrb[25].mxu1  ;;  %v1009_v15 = vmax.f32 %v945_v4, 0.0  ;;  %v876_v17 = vmul.f32 %v1617_v3, %v646_v13 }
 0x118   : > { %v1041_v16 = vmax.f32 %v977_v6, 0.0  ;;  %v908_v18 = vmul.f32 %v1617_v3, %v806_v14  ;;  %1075 = vst.msk [vmem:[%s1635_s6 + $0xb8] sm:$0xff] %vm1051_vm1, %v1010_v9  ;;  %v948_v19 = vadd.f32 %v1622_v5, %v877_v11 }
 0x119   : > { %1107 = vst.msk [vmem:[%s1635_s6 + $0x1b8] sm:$0xff] %vm1051_vm1, %v1042_v10  ;;  %v980_v20 = vadd.f32 %v1622_v5, %v909_v12  ;;  %1074 = vst.msk [vmem:[%s1635_s6 + $0xb0] sm:$0xff] %vm1051_vm1, %v1009_v15  ;;  %v947_v21 = vadd.f32 %v1622_v5, %v876_v17  ;;  %v1360_v23 = vpop.f32.mrb[26].mxu0 }
 0x11a   : > { %1106 = vst.msk [vmem:[%s1635_s6 + $0x1b0] sm:$0xff] %vm1051_vm1, %v1041_v16  ;;  %v979_v22 = vadd.f32 %v1622_v5, %v908_v18  ;;  %v1408_v24 = vpop.f32.mrb[26].mxu1  ;;  %v1012_v25 = vmax.f32 %v948_v19, 0.0  ;;  %v879_v27 = vmul.f32 %v1360_v23, %v1617_v3  ;;  %v656_v29 = vpop.f32.mrb[27].mxu0 }
 0x11b   : > { %v1044_v26 = vmax.f32 %v980_v20, 0.0  ;;  %v911_v28 = vmul.f32 %v1408_v24, %v1617_v3  ;;  %v816_v30 = vpop.f32.mrb[27].mxu1  ;;  %v1011_v31 = vmax.f32 %v947_v21, 0.0  ;;  %v878_v33 = vmul.f32 %v1617_v3, %v656_v29 }
 0x11c   : > { %v1043_v32 = vmax.f32 %v979_v22, 0.0  ;;  %v910_v34 = vmul.f32 %v1617_v3, %v816_v30  ;;  %1077 = vst.msk [vmem:[%s1635_s6 + $0xc8] sm:$0xff] %vm1051_vm1, %v1012_v25  ;;  %v950_v35 = vadd.f32 %v1622_v5, %v879_v27 }
 0x11d   : > { %1109 = vst.msk [vmem:[%s1635_s6 + $0x1c8] sm:$0xff] %vm1051_vm1, %v1044_v26  ;;  %v982_v36 = vadd.f32 %v1622_v5, %v911_v28  ;;  %1076 = vst.msk [vmem:[%s1635_s6 + $0xc0] sm:$0xff] %vm1051_vm1, %v1011_v31  ;;  %v949_v37 = vadd.f32 %v1622_v5, %v878_v33  ;;  %v1363_v39 = vpop.f32.mrb[28].mxu0 }
 0x11e   : > { %1108 = vst.msk [vmem:[%s1635_s6 + $0x1c0] sm:$0xff] %vm1051_vm1, %v1043_v32  ;;  %v981_v38 = vadd.f32 %v1622_v5, %v910_v34  ;;  %v1411_v40 = vpop.f32.mrb[28].mxu1  ;;  %v1014_v41 = vmax.f32 %v950_v35, 0.0  ;;  %v881_v43 = vmul.f32 %v1363_v39, %v1617_v3  ;;  %v666_v45 = vpop.f32.mrb[29].mxu0 }
 0x11f   : > { %v1046_v42 = vmax.f32 %v982_v36, 0.0  ;;  %v913_v44 = vmul.f32 %v1411_v40, %v1617_v3  ;;  %v826_v46 = vpop.f32.mrb[29].mxu1  ;;  %v1013_v47 = vmax.f32 %v949_v37, 0.0  ;;  %v880_v49 = vmul.f32 %v1617_v3, %v666_v45 }
 0x120   : > { %v1045_v48 = vmax.f32 %v981_v38, 0.0  ;;  %v912_v50 = vmul.f32 %v1617_v3, %v826_v46  ;;  %1079 = vst.msk [vmem:[%s1635_s6 + $0xd8] sm:$0xff] %vm1051_vm1, %v1014_v41  ;;  %v952_v51 = vadd.f32 %v1622_v5, %v881_v43 }
 0x121   : > { %1111 = vst.msk [vmem:[%s1635_s6 + $0x1d8] sm:$0xff] %vm1051_vm1, %v1046_v42  ;;  %v984_v52 = vadd.f32 %v1622_v5, %v913_v44  ;;  %1078 = vst.msk [vmem:[%s1635_s6 + $0xd0] sm:$0xff] %vm1051_vm1, %v1013_v47  ;;  %v951_v53 = vadd.f32 %v1622_v5, %v880_v49  ;;  %v1366_v55 = vpop.f32.mrb[30].mxu0 }
 0x122   : > { %1110 = vst.msk [vmem:[%s1635_s6 + $0x1d0] sm:$0xff] %vm1051_vm1, %v1045_v48  ;;  %v983_v54 = vadd.f32 %v1622_v5, %v912_v50  ;;  %v1414_v56 = vpop.f32.mrb[30].mxu1  ;;  %v1016_v57 = vmax.f32 %v952_v51, 0.0  ;;  %v883_v59 = vmul.f32 %v1366_v55, %v1617_v3  ;;  %v676_v61 = vpop.f32.mrb[31].mxu0 }
 0x123   : > { %v1048_v58 = vmax.f32 %v984_v52, 0.0  ;;  %v915_v60 = vmul.f32 %v1414_v56, %v1617_v3  ;;  %v836_v62 = vpop.f32.mrb[31].mxu1  ;;  %v1015_v63 = vmax.f32 %v951_v53, 0.0  ;;  %v882_v1 = vmul.f32 %v1617_v3, %v676_v61 }
 0x124   : > { %v1047_v0 = vmax.f32 %v983_v54, 0.0  ;;  %v914_v2 = vmul.f32 %v1617_v3, %v836_v62  ;;  %1081 = vst.msk [vmem:[%s1635_s6 + $0xe8] sm:$0xff] %vm1051_vm1, %v1016_v57  ;;  %v954_v4 = vadd.f32 %v1622_v5, %v883_v59 }
 0x125   : > { %1113 = vst.msk [vmem:[%s1635_s6 + $0x1e8] sm:$0xff] %vm1051_vm1, %v1048_v58  ;;  %v986_v6 = vadd.f32 %v1622_v5, %v915_v60  ;;  %1080 = vst.msk [vmem:[%s1635_s6 + $0xe0] sm:$0xff] %vm1051_vm1, %v1015_v63  ;;  %v953_v7 = vadd.f32 %v1622_v5, %v882_v1 }
 0x126   : > { %1112 = vst.msk [vmem:[%s1635_s6 + $0x1e0] sm:$0xff] %vm1051_vm1, %v1047_v0  ;;  %v985_v8 = vadd.f32 %v1622_v5, %v914_v2  ;;  %v1018_v9 = vmax.f32 %v954_v4, 0.0 }
 0x127   : > { %v1050_v10 = vmax.f32 %v986_v6, 0.0  ;;  %v1017_v3 = vmax.f32 %v953_v7, 0.0 }
 0x128   : > { %v1049_v11 = vmax.f32 %v985_v8, 0.0  ;;  %1083 = vst.msk [vmem:[%s1635_s6 + $0xf8] sm:$0xff] %vm1051_vm1, %v1018_v9 }
 0x129   : > { %1115 = vst.msk [vmem:[%s1635_s6 + $0x1f8] sm:$0xff] %vm1051_vm1, %v1050_v10  ;;  %1082 = vst.msk [vmem:[%s1635_s6 + $0xf0] sm:$0xff] %vm1051_vm1, %v1017_v3 }
 0x12a   : > { %1114 = vst.msk [vmem:[%s1635_s6 + $0x1f0] sm:$0xff] %vm1051_vm1, %v1049_v11 }
 0x12b PF: > { %s14_s15 = sadd.s32 1, %s1435_s15  }
 0x12c   : > { %p11_p4 = scmp.ge.s32.totalorder %s14_s15, 4  }
 0x12e   :  { %13 = sbr.rel (!%p11_p4) target bundleno = 1 (0x1), region = 66 }

</bundles_post_ra>
